<compile_context>
chip_gen: v5e
topology: v5e:2x2
jax: 0.10.0
libtpu: 0.0.40
codegen_flags: <defaults>
</compile_context>

<pallas_src>
import functools

import jax
import jax.numpy as jnp
from jax import lax
from jax.experimental import pallas as pl
from jax.experimental.pallas import tpu as pltpu


def _round_up(x, m):
    return ((x + m - 1) // m) * m


# ----------------------------- Pallas kernel -------------------------------

def _fused_matmul_bn_kernel(*refs, apply_relu, has_residual):
    """One (tm, Cp) output tile: bf16 matmul (K-tiled, f32 accumulator) fused
    with folded-BN shift, optional residual add and optional ReLU."""
    if has_residual:
        x_ref, w_ref, shift_ref, res_ref, o_ref, acc_ref = refs
    else:
        x_ref, w_ref, shift_ref, o_ref, acc_ref = refs
        res_ref = None

    k = pl.program_id(1)

    @pl.when(k == 0)
    def _():
        acc_ref[...] = jnp.zeros_like(acc_ref)

    acc_ref[...] += jnp.dot(x_ref[...], w_ref[...],
                            preferred_element_type=jnp.float32)

    @pl.when(k == pl.num_programs(1) - 1)
    def _():
        y = acc_ref[...] + shift_ref[...]
        if has_residual:
            y = y + res_ref[...]
        if apply_relu:
            y = jnp.maximum(y, 0.0)
        o_ref[...] = y.astype(o_ref.dtype)


def fused_matmul_bn(x, w_scaled, shift, residual=None, *, apply_relu,
                    tm=256, tk=512):
    """y = relu?( (x @ w_scaled) + shift [+ residual] ).

    x: (M, K) f32 patches.  w_scaled: (K, Cout) f32 weights with the BN scale
    already folded in.  shift: (Cout,) f32.  residual: optional (M, Cout) f32.
    Matmul operands are cast to bf16; accumulation and epilogue are f32.
    """
    M, K = x.shape
    Kw, Cout = w_scaled.shape
    assert K == Kw

    Kp = _round_up(K, 128)
    Cp = _round_up(Cout, 128)
    tm = min(tm, _round_up(M, 128))
    Mp = _round_up(M, tm)
    tk = min(tk, Kp)
    while Kp % tk:            # Kp is a multiple of 128, so this terminates
        tk -= 128
    nk = Kp // tk

    # Pad + cast matmul operands to bf16 (lane-dense K and Cout).
    x_p = jnp.pad(x, ((0, Mp - M), (0, Kp - K))).astype(jnp.bfloat16)
    w_p = jnp.pad(w_scaled, ((0, Kp - K), (0, Cp - Cout))).astype(jnp.bfloat16)
    shift_p = jnp.pad(shift.reshape(1, Cout).astype(jnp.float32),
                      ((0, 0), (0, Cp - Cout)))

    has_residual = residual is not None
    in_specs = [
        pl.BlockSpec((tm, tk), lambda i, k: (i, k)),      # patches tile (bf16)
        pl.BlockSpec((tk, Cp), lambda i, k: (k, 0)),      # weight K-tile (bf16)
        pl.BlockSpec((1, Cp), lambda i, k: (0, 0)),       # folded BN shift
    ]
    args = [x_p, w_p, shift_p]
    if has_residual:
        res_p = jnp.pad(residual.astype(jnp.float32),
                        ((0, Mp - M), (0, Cp - Cout)))
        in_specs.append(pl.BlockSpec((tm, Cp), lambda i, k: (i, 0)))
        args.append(res_p)

    out = pl.pallas_call(
        functools.partial(_fused_matmul_bn_kernel,
                          apply_relu=apply_relu, has_residual=has_residual),
        out_shape=jax.ShapeDtypeStruct((Mp, Cp), jnp.float32),
        grid_spec=pltpu.PrefetchScalarGridSpec(
            num_scalar_prefetch=0,
            grid=(Mp // tm, nk),
            in_specs=in_specs,
            out_specs=pl.BlockSpec((tm, Cp), lambda i, k: (i, 0)),
            scratch_shapes=[pltpu.VMEM((tm, Cp), jnp.float32)],
        ),
        compiler_params=pltpu.CompilerParams(
            dimension_semantics=("parallel", "arbitrary"),
            vmem_limit_bytes=64 * 1024 * 1024),
    )(*args)
    return out[:M, :Cout]


# ------------------------------- glue (JAX) --------------------------------

def _im2col_3x3(x_nhwc, stride):
    """im2col for 3x3 conv, padding=1.  Feature order = c*9 + kh*3 + kw,
    matching PyTorch's weight.reshape(Cout, Cin*9)."""
    N, H, W, C = x_nhwc.shape
    xp = jnp.pad(x_nhwc, ((0, 0), (1, 1), (1, 1), (0, 0)))
    OH = (H + 2 - 3) // stride + 1
    OW = (W + 2 - 3) // stride + 1
    cols = []
    for kh in range(3):
        for kw in range(3):
            sl = xp[:, kh:kh + stride * (OH - 1) + 1:stride,
                    kw:kw + stride * (OW - 1) + 1:stride, :]
            cols.append(sl)                      # (N, OH, OW, C)
    p = jnp.stack(cols, axis=3)                  # (N, OH, OW, 9, C)
    p = jnp.transpose(p, (0, 1, 2, 4, 3))        # (N, OH, OW, C, 9)
    return p.reshape(N * OH * OW, C * 9), (N, OH, OW)


def _bn_fold(gamma, beta, mean, var, eps=1e-5):
    inv = gamma / jnp.sqrt(var + eps)
    return inv, beta - mean * inv


def resnet_basicblock_forward(x_nchw, params, stride):
    x = jnp.transpose(x_nchw, (0, 2, 3, 1)).astype(jnp.float32)   # NHWC
    N, H, W, Cin = x.shape
    w1 = params["w1"]                                             # (Cout,Cin,3,3)
    Cout = w1.shape[0]

    # --- conv1 (3x3, stride) + BN1 + ReLU --- (no residual input)
    p1, (n, oh, ow) = _im2col_3x3(x, stride)
    s1, b1 = _bn_fold(params["bn1_gamma"], params["bn1_beta"],
                      params["bn1_mean"], params["bn1_var"])
    w1m = jnp.transpose(w1.reshape(Cout, Cin * 9), (1, 0)) * s1[None, :]
    y1 = fused_matmul_bn(p1, w1m, b1, None, apply_relu=True)
    y1 = y1.reshape(n, oh, ow, Cout)

    # --- shortcut (1x1 conv + BN, or identity) ---
    if stride != 1 or Cin != Cout:
        xs = x[:, ::stride, ::stride, :].reshape(n * oh * ow, Cin)
        ss, bs = _bn_fold(params["bnsc_gamma"], params["bnsc_beta"],
                          params["bnsc_mean"], params["bnsc_var"])
        wsm = jnp.transpose(params["wsc"].reshape(Cout, Cin), (1, 0)) * ss[None, :]
        shortcut = fused_matmul_bn(xs, wsm, bs, None, apply_relu=False)
    else:
        shortcut = x.reshape(n * oh * ow, Cin)

    # --- conv2 (3x3, stride 1) + BN2 + residual add + ReLU ---
    p2, _ = _im2col_3x3(y1, 1)
    s2, b2 = _bn_fold(params["bn2_gamma"], params["bn2_beta"],
                      params["bn2_mean"], params["bn2_var"])
    w2m = jnp.transpose(params["w2"].reshape(Cout, Cout * 9), (1, 0)) * s2[None, :]
    y2 = fused_matmul_bn(p2, w2m, b2, shortcut, apply_relu=True)

    out = y2.reshape(n, oh, ow, Cout)
    return jnp.transpose(out, (0, 3, 1, 2))                       # back to NCHW


# ------------------------- pure-JAX reference check -------------------------

def reference_forward(x, params, stride, eps=1e-5):
    def conv(x, w, s, pad):
        return lax.conv_general_dilated(
            x, w, (s, s), [(pad, pad), (pad, pad)],
            dimension_numbers=("NCHW", "OIHW", "NCHW"))

    def bn(x, g, b, m, v):
        g, b, m, v = (t[None, :, None, None] for t in (g, b, m, v))
        return (x - m) / jnp.sqrt(v + eps) * g + b

    Cin = x.shape[1]
    Cout = params["w1"].shape[0]
    y = conv(x, params["w1"], stride, 1)
    y = jnp.maximum(bn(y, params["bn1_gamma"], params["bn1_beta"],
                       params["bn1_mean"], params["bn1_var"]), 0.0)
    y = conv(y, params["w2"], 1, 1)
    y = bn(y, params["bn2_gamma"], params["bn2_beta"],
           params["bn2_mean"], params["bn2_var"])
    if stride != 1 or Cin != Cout:
        s = conv(x, params["wsc"], stride, 0)
        s = bn(s, params["bnsc_gamma"], params["bnsc_beta"],
               params["bnsc_mean"], params["bnsc_var"])
    else:
        s = x
    return jnp.maximum(y + s, 0.0)


# ---------------------------------- main ------------------------------------

if __name__ == "__main__":
    in_channels, out_channels, stride = 4, 8, 2
    N, H, W = 2, 16, 16

    key = jax.random.PRNGKey(0)
    kx, kw1, kw2, kws = jax.random.split(key, 4)

    x = jax.random.normal(kx, (N, in_channels, H, W), jnp.float32)

    def bn_params(c, base):
        return dict(
            gamma=1.0 + 0.05 * jnp.arange(c, dtype=jnp.float32),
            beta=0.02 * jnp.arange(c, dtype=jnp.float32) - base,
            mean=0.01 * jnp.arange(c, dtype=jnp.float32),
            var=1.0 + 0.1 * jnp.arange(c, dtype=jnp.float32),
        )

    bn1 = bn_params(out_channels, 0.1)
    bn2 = bn_params(out_channels, 0.2)
    bns = bn_params(out_channels, 0.3)

    params = dict(
        w1=0.1 * jax.random.normal(kw1, (out_channels, in_channels, 3, 3), jnp.float32),
        w2=0.1 * jax.random.normal(kw2, (out_channels, out_channels, 3, 3), jnp.float32),
        wsc=0.1 * jax.random.normal(kws, (out_channels, in_channels, 1, 1), jnp.float32),
        bn1_gamma=bn1["gamma"], bn1_beta=bn1["beta"], bn1_mean=bn1["mean"], bn1_var=bn1["var"],
        bn2_gamma=bn2["gamma"], bn2_beta=bn2["beta"], bn2_mean=bn2["mean"], bn2_var=bn2["var"],
        bnsc_gamma=bns["gamma"], bnsc_beta=bns["beta"], bnsc_mean=bns["mean"], bnsc_var=bns["var"],
    )

    out = resnet_basicblock_forward(x, params, stride)
    out = jax.block_until_ready(out)

    ref = jax.block_until_ready(reference_forward(x, params, stride))
    assert out.shape == ref.shape == (N, out_channels, H // stride, W // stride)
    # bf16 matmul operands (f32 accumulation) -> loosened tolerance vs f32 ref.
    assert jnp.allclose(out, ref, atol=5e-2, rtol=5e-2), float(jnp.max(jnp.abs(out - ref)))

    print("KERNEL_OK")
</pallas_src>

<mosaic_0001>
module attributes {stable_mosaic.version = 11 : i64} {
  func.func @_fused_matmul_bn_kernel(%arg0: i32, %arg1: i32, %arg2: memref<128x128xbf16, #tpu.memory_space<vmem>>, %arg3: memref<128x128xbf16, #tpu.memory_space<vmem>>, %arg4: memref<1x128xf32, #tpu.memory_space<vmem>>, %arg5: memref<128x128xf32, #tpu.memory_space<vmem>>, %arg6: memref<128x128xf32, #tpu.memory_space<vmem>>) attributes {dimension_semantics = [#tpu.dimension_semantics<parallel>, #tpu.dimension_semantics<arbitrary>], iteration_bounds = array<i64: 1, 1>, scalar_prefetch = 0 : i64, scratch_operands = 1 : i64, tpu.core_type = #tpu.core_type<tc>, window_params = [{transform_indices = @transform_0, window_bounds = array<i64: 128, 128>}, {transform_indices = @transform_1, window_bounds = array<i64: 128, 128>}, {pipeline_mode = #tpu.pipeline_mode<synchronous>, transform_indices = @transform_2, window_bounds = array<i64: 1, 128>}, {transform_indices = @transform_3, window_bounds = array<i64: 128, 128>}]} {
    %c0_i32 = arith.constant 0 : i32
    %0 = arith.cmpi eq, %arg1, %c0_i32 : i32
    %1 = arith.extui %0 : i1 to i32
    %c0_i32_0 = arith.constant 0 : i32
    %2 = arith.cmpi ne, %1, %c0_i32_0 : i32
    scf.if %2 {
      %cst_10 = arith.constant 0.000000e+00 : f32
      %12 = vector.broadcast %cst_10 : f32 to vector<128x128xf32>
      %c0_11 = arith.constant 0 : index
      %c0_12 = arith.constant 0 : index
      %13 = vector.load %arg6[%c0_11, %c0_12] : memref<128x128xf32, #tpu.memory_space<vmem>>, vector<128x128xf32>
      tpu.vector_store %arg6[%c0_11, %c0_12], %12 {strides = array<i32>} : memref<128x128xf32, #tpu.memory_space<vmem>>, vector<128x128xf32>,
    } else {
    }
    %c0 = arith.constant 0 : index
    %c0_1 = arith.constant 0 : index
    %3 = vector.load %arg6[%c0, %c0_1] : memref<128x128xf32, #tpu.memory_space<vmem>>, vector<128x128xf32>
    %c0_2 = arith.constant 0 : index
    %c0_3 = arith.constant 0 : index
    %4 = vector.load %arg2[%c0_2, %c0_3] : memref<128x128xbf16, #tpu.memory_space<vmem>>, vector<128x128xbf16>
    %c0_4 = arith.constant 0 : index
    %c0_5 = arith.constant 0 : index
    %5 = vector.load %arg3[%c0_4, %c0_5] : memref<128x128xbf16, #tpu.memory_space<vmem>>, vector<128x128xbf16>
    %cst = arith.constant dense<0.000000e+00> : vector<128x128xf32>
    %6 = tpu.matmul %4, %5, %cst {dimension_numbers = #tpu.dot_dimension_numbers<[1], [0], [0], [1], [0, 0, 1, 1], [], []>} : vector<128x128xbf16>, vector<128x128xbf16>, vector<128x128xf32> -> vector<128x128xf32>
    %7 = arith.addf %3, %6 : vector<128x128xf32>
    %c0_6 = arith.constant 0 : index
    %c0_7 = arith.constant 0 : index
    %8 = vector.load %arg6[%c0_6, %c0_7] : memref<128x128xf32, #tpu.memory_space<vmem>>, vector<128x128xf32>
    tpu.vector_store %arg6[%c0_6, %c0_7], %7 {strides = array<i32>} : memref<128x128xf32, #tpu.memory_space<vmem>>, vector<128x128xf32>,
    %c0_i32_8 = arith.constant 0 : i32
    %9 = arith.cmpi eq, %arg1, %c0_i32_8 : i32
    %10 = arith.extui %9 : i1 to i32
    %c0_i32_9 = arith.constant 0 : i32
    %11 = arith.cmpi ne, %10, %c0_i32_9 : i32
    scf.if %11 {
      %c0_10 = arith.constant 0 : index
      %c0_11 = arith.constant 0 : index
      %12 = vector.load %arg6[%c0_10, %c0_11] : memref<128x128xf32, #tpu.memory_space<vmem>>, vector<128x128xf32>
      %c0_12 = arith.constant 0 : index
      %c0_13 = arith.constant 0 : index
      %13 = vector.load %arg4[%c0_12, %c0_13] : memref<1x128xf32, #tpu.memory_space<vmem>>, vector<1x128xf32>
      %14 = vector.broadcast %13 : vector<1x128xf32> to vector<128x128xf32>
      %15 = arith.addf %12, %14 : vector<128x128xf32>
      %cst_14 = arith.constant 0.000000e+00 : f32
      %16 = vector.broadcast %cst_14 : f32 to vector<128x128xf32>
      %17 = arith.maximumf %15, %16 : vector<128x128xf32>
      %c0_15 = arith.constant 0 : index
      %c0_16 = arith.constant 0 : index
      %18 = vector.load %arg5[%c0_15, %c0_16] : memref<128x128xf32, #tpu.memory_space<vmem>>, vector<128x128xf32>
      tpu.vector_store %arg5[%c0_15, %c0_16], %17 {strides = array<i32>} : memref<128x128xf32, #tpu.memory_space<vmem>>, vector<128x128xf32>,
    } else {
    }
    return
  }
  func.func @transform_0(%arg0: i32, %arg1: i32) -> (i32, i32) {
    %c0_i32 = arith.constant 0 : i32
    return %arg0, %arg1 : i32, i32
  }
  func.func @transform_1(%arg0: i32, %arg1: i32) -> (i32, i32) {
    %c0_i32 = arith.constant 0 : i32
    %c0_i32_0 = arith.constant 0 : i32
    return %arg1, %c0_i32 : i32, i32
  }
  func.func @transform_2(%arg0: i32, %arg1: i32) -> (i32, i32) {
    %c0_i32 = arith.constant 0 : i32
    %c0_i32_0 = arith.constant 0 : i32
    %c0_i32_1 = arith.constant 0 : i32
    return %c0_i32, %c0_i32_0 : i32, i32
  }
  func.func @transform_3(%arg0: i32, %arg1: i32) -> (i32, i32) {
    %c0_i32 = arith.constant 0 : i32
    %c0_i32_0 = arith.constant 0 : i32
    return %arg0, %c0_i32 : i32, i32
  }
}

</mosaic_0001>

<bundles_post_ra>
// kernel: tpu_custom_call.1
= control target key start
LH: loop header
LB: loop body
LE: loop exit
PB: predicated region body
PF: predicated region fallthrough
CT: control target
= control target key end

     0   :  { %8 = vsyncpa [#allocation4], 0  ;;  %s630_s0 = inlined_call_operand.hbm [shape: bf16[128,128], index: 0, kind: input, shape index: {}]   ;;  %s631_s1 = inlined_call_operand.hbm [shape: bf16[128,128], index: 1, kind: input, shape index: {}]   ;;  %s632_s2 = inlined_call_operand.vmem [shape: f32[1,128], index: 2, kind: input, shape index: {}]   ;;  %s633_s3 = inlined_call_operand.hbm [shape: f32[128,128], index: 3, kind: output, shape index: {}]  }
   0x1   :  { %9 = vsyncpa [#allocation7], 0 }
   0x2   :  { %10 = vsyncpa [#allocation5], 0  ;;  %s15_s14 = sshll.u32 %s630_s0, 4  ;;  %s573_s15 = smov [#allocation3]   ;;  %s16_s14 = int_to_ptr.hbm [resolvable:$true] %s15_s14 }
   0x3   :  { %s17_s16 = sshll.u32 %s573_s15, 4  ;;  %s28_s19 = sshll.u32 %s631_s1, 4  ;;  %s18_s16 = int_to_ptr.vmem [resolvable:$true] %s17_s16  ;;  %s29_s19 = int_to_ptr.hbm [resolvable:$true] %s28_s19 }
   0x4   :  { %s574_s20 = smov 64   ;;  %s575_s21 = smov 4  }
   0x5   :  { %23 = dma.hbm_to_vmem [thread:$0]  %s16_s14, 1024, %s18_s16, [#allocation4], %s574_s20, %s574_s20, %s575_s21  }
   0x6   :  { %s576_s22 = smov [#allocation6]  }
   0x7   :  { %s30_s23 = sshll.u32 %s576_s22, 4  ;;  %s31_s23 = int_to_ptr.vmem [resolvable:$true] %s30_s23 }
   0x8   :  { %36 = dma.hbm_to_vmem [thread:$0]  %s29_s19, 1024, %s31_s23, [#allocation7], %s574_s20, %s574_s20, %s575_s21  }
   0x9   :  { %567 = dma.done.wait [#allocation4], 1024  }
   0xa   :  { %568 = vsyncadd [#allocation4], 4294966272 }
   0xb   :  { %569 = dma.done.wait [#allocation7], 1024  }
   0xc   :  { %570 = vsyncadd [#allocation7], 4294966272  ;;  %v462_v0 = vld [vmem:[#allocation6 + $0x38] sm:$0xff]  ;;  %v461_v1 = vld [vmem:[#allocation6 + $0x30] sm:$0xff]  ;;  %s369_s27 = sshll.u32 %s633_s3, 4  ;;  %s578_s28 = smov 128   ;;  %s370_s27 = int_to_ptr.hbm [resolvable:$true] %s369_s27 }
   0xd   :  { %211 = vmatpush.bf16.msra.mxu0 %v462_v0  ;;  %463 = vmatpush.bf16.msra.mxu1 %v462_v0  ;;  %v460_v2 = vld [vmem:[#allocation6 + $0x28] sm:$0xff]  ;;  %v459_v3 = vld [vmem:[#allocation6 + $0x20] sm:$0xff]  ;;  %v458_v4 = vld [vmem:[#allocation6 + $0x18] sm:$0xff]  ;;  %s579_s29 = smov 8  }
   0xe   :  { %464 = vmatpush.bf16.msra.mxu2 %v462_v0  ;;  %465 = vmatpush.bf16.msra.mxu3 %v462_v0  ;;  %v457_v5 = vld [vmem:[#allocation6 + $0x10] sm:$0xff]  ;;  %v456_v6 = vld [vmem:[#allocation6 + $0x8] sm:$0xff]  ;;  %v455_v7 = vld [vmem:[#allocation6] sm:$0xff] }
   0xf   :  { %v447_v8 = vld [vmem:[#allocation3] sm:$0xff]  ;;  %v449_v9 = vld [vmem:[#allocation3 + $0x10] sm:$0xff]  ;;  %v448_v12 = vld [vmem:[#allocation3 + $0x8] sm:$0xff] }
  0x10   :  { %v451_v10 = vld [vmem:[#allocation3 + $0x20] sm:$0xff]  ;;  %v453_v11 = vld [vmem:[#allocation3 + $0x30] sm:$0xff]  ;;  %v450_v13 = vld [vmem:[#allocation3 + $0x18] sm:$0xff] }
  0x11   :  { %212 = vmatpush.bf16.msra.mxu0 %v461_v1  ;;  %466 = vmatpush.bf16.msra.mxu1 %v461_v1  ;;  %v452_v14 = vld [vmem:[#allocation3 + $0x28] sm:$0xff]  ;;  %v454_v15 = vld [vmem:[#allocation3 + $0x38] sm:$0xff]  ;;  %v609_v16 = vld [vmem:[%s632_s2] ss:$0 sm:$0xff]  ;;  %s577_s2 = smov [#allocation8]  }
  0x12   :  { %467 = vmatpush.bf16.msra.mxu2 %v461_v1  ;;  %468 = vmatpush.bf16.msra.mxu3 %v461_v1  ;;  %s367_s24 = sshll.u32 %s577_s2, 4  ;;  %s368_s24 = int_to_ptr.vmem [resolvable:$true] %s367_s24 }
  0x15   :  { %213 = vmatpush.bf16.msra.mxu0 %v460_v2  ;;  %469 = vmatpush.bf16.msra.mxu1 %v460_v2 }
  0x16   :  { %470 = vmatpush.bf16.msra.mxu2 %v460_v2  ;;  %471 = vmatpush.bf16.msra.mxu3 %v460_v2 }
  0x19   :  { %214 = vmatpush.bf16.msra.mxu0 %v459_v3  ;;  %472 = vmatpush.bf16.msra.mxu1 %v459_v3 }
  0x1a   :  { %473 = vmatpush.bf16.msra.mxu2 %v459_v3  ;;  %474 = vmatpush.bf16.msra.mxu3 %v459_v3 }
  0x1d   :  { %215 = vmatpush.bf16.msra.mxu0 %v458_v4  ;;  %475 = vmatpush.bf16.msra.mxu1 %v458_v4 }
  0x1e   :  { %476 = vmatpush.bf16.msra.mxu2 %v458_v4  ;;  %477 = vmatpush.bf16.msra.mxu3 %v458_v4 }
  0x21   :  { %216 = vmatpush.bf16.msra.mxu0 %v457_v5  ;;  %478 = vmatpush.bf16.msra.mxu1 %v457_v5 }
  0x22   :  { %479 = vmatpush.bf16.msra.mxu2 %v457_v5  ;;  %480 = vmatpush.bf16.msra.mxu3 %v457_v5 }
  0x25   :  { %217 = vmatpush.bf16.msra.mxu0 %v456_v6  ;;  %481 = vmatpush.bf16.msra.mxu1 %v456_v6 }
  0x26   :  { %482 = vmatpush.bf16.msra.mxu2 %v456_v6  ;;  %483 = vmatpush.bf16.msra.mxu3 %v456_v6 }
  0x29   :  { %218 = vmatpush.bf16.msra.mxu0 %v455_v7  ;;  %484 = vmatpush.bf16.msra.mxu1 %v455_v7 }
  0x2a   :  { %485 = vmatpush.bf16.msra.mxu2 %v455_v7  ;;  %486 = vmatpush.bf16.msra.mxu3 %v455_v7 }
  0x2c   :  { %219 = vmatmul.bf16.vlgmr.msra.gmra.mxu0 %v447_v8  ;;  %229 = vmatmul.bf16.vlgmr.msra.gmra.mxu1 %v449_v9 }
  0x2d   :  { %239 = vmatmul.bf16.vlgmr.msra.gmra.mxu2 %v451_v10  ;;  %249 = vmatmul.bf16.vlgmr.msra.gmra.mxu3 %v453_v11 }
  0x3c   :  { %224 = vmatmul.bf16.gmra.mxu0 %v448_v12  ;;  %234 = vmatmul.bf16.gmra.mxu1 %v450_v13 }
  0x3d   :  { %244 = vmatmul.bf16.gmra.mxu2 %v452_v14  ;;  %254 = vmatmul.bf16.gmra.mxu3 %v454_v15 }
  0xa9   :  { %v220_v17 = vpop.f32.mrf.mxu0  ;;  %v230_v18 = vpop.f32.mrf.mxu1 }
  0xaa   :  { %v315_v19 = vadd.f32 %v609_v16, %v220_v17  ;;  %v319_v20 = vadd.f32 %v609_v16, %v230_v18 }
  0xac   :  { %v331_v21 = vmax.f32 %v315_v19, 0.0  ;;  %v335_v22 = vmax.f32 %v319_v20, 0.0 }
  0xae   :  { %347 = vst [vmem:[#allocation8] sm:$0xff] %v331_v21 }
  0xaf   :  { %351 = vst [vmem:[#allocation8 + $0x20] sm:$0xff] %v335_v22 }
  0xb0   :  { %v240_v23 = vpop.f32.mrf.mxu2  ;;  %v250_v24 = vpop.f32.mrf.mxu3 }
  0xb1   :  { %v323_v25 = vadd.f32 %v609_v16, %v240_v23  ;;  %v327_v26 = vadd.f32 %v609_v16, %v250_v24  ;;  %v222_v27 = vpop.f32.mrf.mxu0  ;;  %v232_v28 = vpop.f32.mrf.mxu1 }
  0xb2   :  { %v316_v29 = vadd.f32 %v609_v16, %v222_v27  ;;  %v320_v30 = vadd.f32 %v609_v16, %v232_v28 }
  0xb3   :  { %v339_v31 = vmax.f32 %v323_v25, 0.0  ;;  %v343_v32 = vmax.f32 %v327_v26, 0.0 }
  0xb4   :  { %v332_v33 = vmax.f32 %v316_v29, 0.0  ;;  %v336_v34 = vmax.f32 %v320_v30, 0.0 }
  0xb5   :  { %355 = vst [vmem:[#allocation8 + $0x40] sm:$0xff] %v339_v31 }
  0xb6   :  { %359 = vst [vmem:[#allocation8 + $0x60] sm:$0xff] %v343_v32 }
  0xb7   :  { %348 = vst [vmem:[#allocation8 + $0x8] sm:$0xff] %v332_v33 }
  0xb8   :  { %352 = vst [vmem:[#allocation8 + $0x28] sm:$0xff] %v336_v34  ;;  %v242_v35 = vpop.f32.mrf.mxu2  ;;  %v252_v36 = vpop.f32.mrf.mxu3 }
  0xb9   :  { %v324_v37 = vadd.f32 %v609_v16, %v242_v35  ;;  %v328_v38 = vadd.f32 %v609_v16, %v252_v36  ;;  %v225_v39 = vpop.f32.mrf.mxu0  ;;  %v235_v40 = vpop.f32.mrf.mxu1 }
  0xba   :  { %v317_v41 = vadd.f32 %v609_v16, %v225_v39  ;;  %v321_v42 = vadd.f32 %v609_v16, %v235_v40 }
  0xbb   :  { %v340_v43 = vmax.f32 %v324_v37, 0.0  ;;  %v344_v44 = vmax.f32 %v328_v38, 0.0 }
  0xbc   :  { %v333_v45 = vmax.f32 %v317_v41, 0.0  ;;  %v337_v46 = vmax.f32 %v321_v42, 0.0 }
  0xbd   :  { %356 = vst [vmem:[#allocation8 + $0x48] sm:$0xff] %v340_v43 }
  0xbe   :  { %360 = vst [vmem:[#allocation8 + $0x68] sm:$0xff] %v344_v44 }
  0xbf   :  { %349 = vst [vmem:[#allocation8 + $0x10] sm:$0xff] %v333_v45 }
  0xc0   :  { %353 = vst [vmem:[#allocation8 + $0x30] sm:$0xff] %v337_v46  ;;  %v245_v47 = vpop.f32.mrf.mxu2  ;;  %v255_v48 = vpop.f32.mrf.mxu3 }
  0xc1   :  { %v325_v49 = vadd.f32 %v609_v16, %v245_v47  ;;  %v329_v50 = vadd.f32 %v609_v16, %v255_v48  ;;  %v227_v51 = vpop.f32.mrf.mxu0  ;;  %v237_v52 = vpop.f32.mrf.mxu1 }
  0xc2   :  { %v318_v53 = vadd.f32 %v609_v16, %v227_v51  ;;  %v322_v54 = vadd.f32 %v609_v16, %v237_v52 }
  0xc3   :  { %v341_v55 = vmax.f32 %v325_v49, 0.0  ;;  %v345_v56 = vmax.f32 %v329_v50, 0.0 }
  0xc4   :  { %v334_v57 = vmax.f32 %v318_v53, 0.0  ;;  %v338_v58 = vmax.f32 %v322_v54, 0.0 }
  0xc5   :  { %357 = vst [vmem:[#allocation8 + $0x50] sm:$0xff] %v341_v55 }
  0xc6   :  { %361 = vst [vmem:[#allocation8 + $0x70] sm:$0xff] %v345_v56 }
  0xc7   :  { %350 = vst [vmem:[#allocation8 + $0x18] sm:$0xff] %v334_v57 }
  0xc8   :  { %354 = vst [vmem:[#allocation8 + $0x38] sm:$0xff] %v338_v58  ;;  %v247_v59 = vpop.f32.mrf.mxu2  ;;  %v257_v60 = vpop.f32.mrf.mxu3 }
  0xc9   :  { %v326_v61 = vadd.f32 %v609_v16, %v247_v59  ;;  %v330_v62 = vadd.f32 %v609_v16, %v257_v60 }
  0xcb   :  { %v342_v63 = vmax.f32 %v326_v61, 0.0  ;;  %v346_v0 = vmax.f32 %v330_v62, 0.0 }
  0xcd   :  { %358 = vst [vmem:[#allocation8 + $0x58] sm:$0xff] %v342_v63 }
  0xce   :  { %362 = vst [vmem:[#allocation8 + $0x78] sm:$0xff] %v346_v0 }
  0xcf   :  { %375 = dma.vmem_to_hbm [thread:$0]  %s368_s24, 2048, %s370_s27, [#allocation5], %s578_s28, %s578_s28, %s579_s29  }
  0xd0   :  { %571 = dma.done.wait [#allocation5], 2048  }
  0xd1   :  { %572 = vsyncadd [#allocation5], 4294965248 }
  0xd2   :  { %380 = vsyncpa [#allocation4], 1 }
  0xd3   :  { %381 = vsyncpa [#allocation7], 1 }
  0xd4   :  { %382 = vsyncpa [#allocation5], 1 }

</bundles_post_ra>
